<compile_context>
chip_gen: v6e
topology: v6e:2x2x1
jax: 0.10.0
libtpu: 0.0.40
codegen_flags: <defaults>
</compile_context>

<pallas_src>
import math
import functools

import jax
import jax.numpy as jnp
from jax import lax
from jax.experimental import pallas as pl
from jax.experimental.pallas import tpu as pltpu

_VMEM_LIMIT = 32 * 1024 * 1024      # explicit scoped-VMEM limit (safe on v5e..v7x)
_SEQ_TILE = 256                     # flash q/kv tile (VMEM bounded independent of S)
_COMPUTE_DTYPE = jnp.bfloat16       # MXU operand / inter-kernel dtype


def _round_up(x, m):
    return (x + m - 1) // m * m


def _plan(dim, pref):
    """Return (tile, padded_dim).

    dim <= pref  -> full-extent block (always legal regardless of (8,128) rule).
    dim >  pref  -> fixed 8/128-aligned tile, dim padded up to a multiple of it.
    """
    if dim <= pref:
        return dim, dim
    return pref, _round_up(dim, pref)


# =============================================================================
# Tiled linear kernel:  y[s] = x @ W[s] + b[s]   (optionally stacked weights)
#   grid = (M/tm, nstack, N/tn, K/tk); f32 VMEM accumulator; bf16 MXU operands.
# =============================================================================
def _linear_kernel(x_ref, w_ref, b_ref, o_ref, acc_ref):
    @pl.when(pl.program_id(3) == 0)
    def _init():
        acc_ref[...] = jnp.zeros_like(acc_ref)

    acc_ref[...] += jnp.dot(
        x_ref[...].astype(jnp.bfloat16),          # no-op if already bf16
        w_ref[...].astype(jnp.bfloat16),
        preferred_element_type=jnp.float32)       # f32 accumulation on the MXU

    @pl.when(pl.program_id(3) == pl.num_programs(3) - 1)
    def _finalize():
        o_ref[...] = (acc_ref[...] + b_ref[...]).astype(o_ref.dtype)


def linear(x2d, w, b, *, out_dtype=jnp.float32, tm=512, tn=256, tk=512):
    """x2d: [M, K].  w: [K, N] -> [M, N], or stacked [S, K, N] -> [S, M, N].
    b: [N] or [S, N] (kept f32, added after f32 accumulation)."""
    squeeze = (w.ndim == 2)
    if squeeze:
        w = w[None]
        b = b[None]
    nstack, K, N = w.shape
    M, K2 = x2d.shape
    assert K == K2, (K, K2)

    tm, Mp = _plan(M, tm)
    tn, Np = _plan(N, tn)
    tk, Kp = _plan(K, tk)
    if (Mp, Kp) != (M, K):
        x2d = jnp.pad(x2d, ((0, Mp - M), (0, Kp - K)))
    if (Kp, Np) != (K, N):
        w = jnp.pad(w, ((0, 0), (0, Kp - K), (0, Np - N)))
    if Np != N:
        b = jnp.pad(b, ((0, 0), (0, Np - N)))
    b = b.reshape(nstack, 1, Np).astype(jnp.float32)

    cost = pl.CostEstimate(
        flops=2 * nstack * Mp * Kp * Np,
        transcendentals=0,
        bytes_accessed=(x2d.dtype.itemsize * Mp * Kp
                        + w.dtype.itemsize * nstack * Kp * Np
                        + 4 * nstack * Np
                        + jnp.dtype(out_dtype).itemsize * nstack * Mp * Np))

    out = pl.pallas_call(
        _linear_kernel,
        out_shape=jax.ShapeDtypeStruct((nstack, Mp, Np), out_dtype),
        grid_spec=pltpu.PrefetchScalarGridSpec(
            num_scalar_prefetch=0,
            grid=(Mp // tm, nstack, Np // tn, Kp // tk),
            in_specs=[
                pl.BlockSpec((tm, tk), lambda i, s, j, k: (i, k)),
                pl.BlockSpec((None, tk, tn), lambda i, s, j, k: (s, k, j)),
                pl.BlockSpec((None, 1, tn), lambda i, s, j, k: (s, 0, j)),
            ],
            out_specs=pl.BlockSpec((None, tm, tn), lambda i, s, j, k: (s, i, j)),
            scratch_shapes=[pltpu.VMEM((tm, tn), jnp.float32)],
        ),
        compiler_params=pltpu.CompilerParams(
            dimension_semantics=("parallel", "parallel", "parallel", "arbitrary"),
            vmem_limit_bytes=_VMEM_LIMIT),
        cost_estimate=cost,
    )(x2d, w, b)

    if Mp != M or Np != N:
        out = out[:, :M, :N]
    return out[0] if squeeze else out


# =============================================================================
# Flash attention kernel
#   grid = (B, head_group, q_block, kv_block); online softmax with m/l/acc scratch.
#   qkv tensor is [3, B, Sp, D]; a head group of G heads is a (tq|tkv, G*head_dim)
#   column block whose lane width is a multiple of 128 (or the full D).
# =============================================================================
def _head_group(num_heads, head_dim):
    """Smallest G dividing num_heads with a 128-lane-aligned group width; fall back
    to all heads (group width == hidden_dim -> full-extent block, always legal)."""
    for g in range(1, num_heads + 1):
        if num_heads % g == 0 and (g * head_dim) % 128 == 0:
            return g
    return num_heads


def _flash_attn_kernel(q_ref, k_ref, v_ref, pad_ref, o_ref,
                       m_scr, l_scr, acc_scr, *,
                       heads_per_group, head_dim, tq, tkv, use_pad):
    qi = pl.program_id(2)
    ki = pl.program_id(3)

    @pl.when(ki == 0)
    def _init():
        m_scr[...] = jnp.full_like(m_scr, -1e30)
        l_scr[...] = jnp.zeros_like(l_scr)
        acc_scr[...] = jnp.zeros_like(acc_scr)

    q_start = qi * tq
    kv_start = ki * tkv

    # Skip kv blocks that lie entirely above the causal diagonal.
    # TODO(synk): also avoid the k/v DMA for skipped blocks (needs an index_map
    # that clamps the kv block index instead of the BlockSpec-driven fetch).
    @pl.when(kv_start <= q_start + (tq - 1))
    def _update():
        row = q_start + lax.broadcasted_iota(jnp.int32, (tq, tkv), 0)
        col = kv_start + lax.broadcasted_iota(jnp.int32, (tq, tkv), 1)
        masked = col > row
        if use_pad:
            masked = jnp.logical_or(masked, (pad_ref[0, :] == 0.0)[None, :])
        neg = jnp.float32(-1e30)          # finite: no NaN for fully-masked rows

        for h in range(heads_per_group):  # small static unroll (G is 1..4 typically)
            lo = h * head_dim
            hi = lo + head_dim
            q = q_ref[0, :, lo:hi].astype(jnp.bfloat16)   # scale folded into wq/bq
            k = k_ref[0, :, lo:hi].astype(jnp.bfloat16)
            v = v_ref[0, :, lo:hi].astype(jnp.bfloat16)

            # Contract on head_dim directly -> no explicit k transpose.
            s = lax.dot_general(q, k, (((1,), (1,)), ((), ())),
                                preferred_element_type=jnp.float32)  # [tq, tkv]
            s = jnp.where(masked, neg, s)

            m_old = m_scr[h]
            m_new = jnp.maximum(m_old, jnp.max(s, axis=-1, keepdims=True))
            alpha = jnp.exp(m_old - m_new)
            p = jnp.exp(s - m_new)
            l_scr[h] = alpha * l_scr[h] + jnp.sum(p, axis=-1, keepdims=True)
            acc_scr[h] = alpha * acc_scr[h] + jnp.dot(
                p.astype(jnp.bfloat16), v, preferred_element_type=jnp.float32)
            m_scr[h] = m_new

    @pl.when(ki == pl.num_programs(3) - 1)
    def _finalize():
        for h in range(heads_per_group):
            lo = h * head_dim
            hi = lo + head_dim
            l = l_scr[h]
            inv = pl.reciprocal(l, approx=True)       # EUP slot
            inv = inv * (2.0 - l * inv)               # one Newton step -> ~f32 exact
            o_ref[:, lo:hi] = (acc_scr[h] * inv).astype(o_ref.dtype)


def flash_attention(qkv, pad_mask, *, num_heads, tq, tkv, use_pad,
                    out_dtype=_COMPUTE_DTYPE):
    """qkv: [3, B, Sp, D] (q pre-scaled); pad_mask: [B, 1, Sp] (1 keep / 0 masked
    key).  Returns [B, Sp, D] in lane-dense layout."""
    _, B, Sp, D = qkv.shape
    assert D % num_heads == 0
    head_dim = D // num_heads
    G = _head_group(num_heads, head_dim)
    gw = G * head_dim
    n_groups = num_heads // G
    nq = Sp // tq
    nk = Sp // tkv

    kernel = functools.partial(
        _flash_attn_kernel, heads_per_group=G, head_dim=head_dim,
        tq=tq, tkv=tkv, use_pad=use_pad)

    cost = pl.CostEstimate(
        flops=4 * B * num_heads * Sp * Sp * head_dim,
        transcendentals=2 * B * num_heads * Sp * Sp,
        bytes_accessed=(qkv.dtype.itemsize * 3 * B * Sp * D * nq
                        + 4 * B * Sp
                        + jnp.dtype(out_dtype).itemsize * B * Sp * D))

    return pl.pallas_call(
        kernel,
        out_shape=jax.ShapeDtypeStruct((B, Sp, D), out_dtype),
        grid_spec=pltpu.PrefetchScalarGridSpec(
            num_scalar_prefetch=0,
            grid=(B, n_groups, nq, nk),
            in_specs=[
                pl.BlockSpec((None, 1, tq, gw),  lambda b, g, i, j: (0, b, i, g)),
                pl.BlockSpec((None, 1, tkv, gw), lambda b, g, i, j: (1, b, j, g)),
                pl.BlockSpec((None, 1, tkv, gw), lambda b, g, i, j: (2, b, j, g)),
                pl.BlockSpec((None, 1, tkv),     lambda b, g, i, j: (b, 0, j)),
            ],
            out_specs=pl.BlockSpec((None, tq, gw), lambda b, g, i, j: (b, i, g)),
            scratch_shapes=[
                pltpu.VMEM((G, tq, 1), jnp.float32),          # running max m
                pltpu.VMEM((G, tq, 1), jnp.float32),          # running denom l
                pltpu.VMEM((G, tq, head_dim), jnp.float32),   # output accumulator
            ],
        ),
        compiler_params=pltpu.CompilerParams(
            dimension_semantics=("parallel", "parallel", "parallel", "arbitrary"),
            vmem_limit_bytes=_VMEM_LIMIT),
        cost_estimate=cost,
    )(qkv, qkv, qkv, pad_mask)


# =============================================================================
# Parameter preparation + full module forward
# =============================================================================
def prepare_params(params, num_heads, compute_dtype=_COMPUTE_DTYPE):
    """One-time: stack q/k/v weights -> [3, D, D], fold 1/sqrt(head_dim) into the
    q projection, pre-cast MXU weights to bf16 (biases stay f32)."""
    if "w_qkv" in params:
        return params
    D = params["wq"].shape[0]
    head_dim = D // num_heads
    scale = 1.0 / math.sqrt(head_dim)
    p = dict(params)
    p["w_qkv"] = jnp.stack(
        [params["wq"] * scale, params["wk"], params["wv"]], axis=0
    ).astype(compute_dtype)
    p["b_qkv"] = jnp.stack(
        [params["bq"] * scale, params["bk"], params["bv"]], axis=0
    ).astype(jnp.float32)
    p["wo_c"] = params["wo"].astype(compute_dtype)
    p["bo_c"] = params["bo"].astype(jnp.float32)
    return p


def standard_attention_forward(params, hidden_states, attention_mask=None,
                               num_heads=4):
    B, S, D = hidden_states.shape
    assert D % num_heads == 0
    params = prepare_params(params, num_heads)

    # Sequence tiling plan: bounded flash tiles; pad + key-mask any remainder.
    tq = tkv = S if S <= _SEQ_TILE else _SEQ_TILE
    Sp = _round_up(S, tq)

    x = hidden_states
    if Sp != S:
        x = jnp.pad(x, ((0, 0), (0, Sp - S), (0, 0)))

    use_pad = (attention_mask is not None) or (Sp != S)
    if attention_mask is not None:
        pad = attention_mask.astype(jnp.float32)
    else:
        pad = jnp.ones((B, S), jnp.float32)
    if Sp != S:
        pad = jnp.pad(pad, ((0, 0), (0, Sp - S)))   # padded keys masked out
    pad = pad.reshape(B, 1, Sp)

    # Fused QKV projection: x read once; stacked [3, B*Sp, D] bf16 output.
    qkv = linear(x.reshape(B * Sp, D), params["w_qkv"], params["b_qkv"],
                 out_dtype=_COMPUTE_DTYPE)
    qkv = qkv.reshape(3, B, Sp, D)

    # Flash attention: online softmax over kv tiles, head-group streaming.
    o = flash_attention(qkv, pad, num_heads=num_heads, tq=tq, tkv=tkv,
                        use_pad=use_pad)

    # Output projection; final result f32 to match the module's dtype.
    out = linear(o.reshape(B * Sp, D), params["wo_c"], params["bo_c"],
                 out_dtype=jnp.float32)
    out = out.reshape(B, Sp, D)
    if Sp != S:
        out = out[:, :S]
    # Dropout: identity in eval mode.
    # TODO(synk): train-mode dropout would use pltpu.prng_seed + stateful_bernoulli.
    return out


# =============================================================================
# Deterministic parameter init (matches nn.Linear shapes; uniform like PyTorch)
# =============================================================================
def init_params(key, hidden_dim):
    bound = 1.0 / math.sqrt(hidden_dim)
    keys = jax.random.split(key, 8)

    def u(k, shape):
        return jax.random.uniform(k, shape, jnp.float32, -bound, bound)

    # Weights stored as [Din, Dout] (transposed vs torch's [out, in]).
    return {
        "wq": u(keys[0], (hidden_dim, hidden_dim)), "bq": u(keys[1], (hidden_dim,)),
        "wk": u(keys[2], (hidden_dim, hidden_dim)), "bk": u(keys[3], (hidden_dim,)),
        "wv": u(keys[4], (hidden_dim, hidden_dim)), "bv": u(keys[5], (hidden_dim,)),
        "wo": u(keys[6], (hidden_dim, hidden_dim)), "bo": u(keys[7], (hidden_dim,)),
    }


# =============================================================================
# Pure-JAX f32 reference (correctness sanity check)
# =============================================================================
def reference_forward(params, x, num_heads, attention_mask=None):
    B, S, D = x.shape
    hd = D // num_heads

    def lin(t, w, b):
        return t @ w + b

    def heads(t):
        return t.reshape(B, S, num_heads, hd).transpose(0, 2, 1, 3)

    q = heads(lin(x, params["wq"], params["bq"]))
    k = heads(lin(x, params["wk"], params["bk"]))
    v = heads(lin(x, params["wv"], params["bv"]))
    s = jnp.einsum("bhqd,bhkd->bhqk", q, k) / math.sqrt(hd)
    causal = jnp.triu(jnp.ones((S, S), dtype=bool), k=1)
    s = jnp.where(causal[None, None], -jnp.inf, s)
    if attention_mask is not None:
        key_mask = (attention_mask == 0)[:, None, None, :]
        s = jnp.where(key_mask, -jnp.inf, s)
    p = jax.nn.softmax(s, axis=-1)
    o = jnp.einsum("bhqk,bhkd->bhqd", p, v)
    o = o.transpose(0, 2, 1, 3).reshape(B, S, D)
    return lin(o, params["wo"], params["bo"])


if __name__ == "__main__":
    B, S, D, H = 2, 8, 32, 4

    key = jax.random.PRNGKey(0)
    pkey, xkey = jax.random.split(key)
    raw_params = init_params(pkey, D)
    params = prepare_params(raw_params, H)
    x = jax.random.normal(xkey, (B, S, D), dtype=jnp.float32)

    # 1) no padding mask (causal only)
    out = standard_attention_forward(params, x, attention_mask=None, num_heads=H)
    out = jax.block_until_ready(out)
    ref = reference_forward(raw_params, x, H)
    assert out.shape == (B, S, D)
    # bf16 MXU operands -> compare at bf16-appropriate tolerance.
    assert jnp.allclose(out, ref, atol=3e-2, rtol=3e-2), "mismatch (no mask)"

    # 2) with a key-padding mask (last two key positions masked out)
    mask = jnp.ones((B, S), jnp.float32).at[:, -2:].set(0.0)
    out_m = standard_attention_forward(params, x, attention_mask=mask, num_heads=H)
    out_m = jax.block_until_ready(out_m)
    ref_m = reference_forward(raw_params, x, H, attention_mask=mask)
    assert jnp.allclose(out_m, ref_m, atol=3e-2, rtol=3e-2), "mismatch (pad mask)"

    print("KERNEL_OK")
</pallas_src>

<mosaic_0001>
module attributes {stable_mosaic.version = 11 : i64} {
  func.func @_linear_kernel(%arg0: i32, %arg1: i32, %arg2: i32, %arg3: i32, %arg4: memref<16x32xf32, #tpu.memory_space<vmem>>, %arg5: memref<1x32x32xbf16, #tpu.memory_space<vmem>>, %arg6: memref<1x1x32xf32, #tpu.memory_space<vmem>>, %arg7: memref<1x16x32xbf16, #tpu.memory_space<vmem>>, %arg8: memref<16x32xf32, #tpu.memory_space<vmem>>) attributes {dimension_semantics = [#tpu.dimension_semantics<parallel>, #tpu.dimension_semantics<parallel>, #tpu.dimension_semantics<parallel>, #tpu.dimension_semantics<arbitrary>], iteration_bounds = array<i64: 1, 3, 1, 1>, scalar_prefetch = 0 : i64, scratch_operands = 1 : i64, tpu.core_type = #tpu.core_type<tc>, window_params = [{transform_indices = @transform_0, window_bounds = array<i64: 16, 32>}, {transform_indices = @transform_1, window_bounds = array<i64: 1, 32, 32>}, {transform_indices = @transform_2, window_bounds = array<i64: 1, 1, 32>}, {transform_indices = @transform_3, window_bounds = array<i64: 1, 16, 32>}]} {
    %c0_i32 = arith.constant 0 : i32
    %0 = arith.cmpi eq, %arg3, %c0_i32 : i32
    %1 = arith.extui %0 : i1 to i32
    %c0_i32_0 = arith.constant 0 : i32
    %2 = arith.cmpi ne, %1, %c0_i32_0 : i32
    scf.if %2 {
      %cst_11 = arith.constant 0.000000e+00 : f32
      %14 = vector.broadcast %cst_11 : f32 to vector<16x32xf32>
      %c0_12 = arith.constant 0 : index
      %c0_13 = arith.constant 0 : index
      %15 = vector.load %arg8[%c0_12, %c0_13] : memref<16x32xf32, #tpu.memory_space<vmem>>, vector<16x32xf32>
      tpu.vector_store %arg8[%c0_12, %c0_13], %14 {strides = array<i32>} : memref<16x32xf32, #tpu.memory_space<vmem>>, vector<16x32xf32>,
    } else {
    }
    %c0 = arith.constant 0 : index
    %c0_1 = arith.constant 0 : index
    %3 = vector.load %arg8[%c0, %c0_1] : memref<16x32xf32, #tpu.memory_space<vmem>>, vector<16x32xf32>
    %c0_2 = arith.constant 0 : index
    %c0_3 = arith.constant 0 : index
    %4 = vector.load %arg4[%c0_2, %c0_3] : memref<16x32xf32, #tpu.memory_space<vmem>>, vector<16x32xf32>
    %5 = arith.truncf %4 : vector<16x32xf32> to vector<16x32xbf16>
    %c0_4 = arith.constant 0 : index
    %c0_5 = arith.constant 0 : index
    %c0_6 = arith.constant 0 : index
    %6 = vector.load %arg5[%c0_4, %c0_5, %c0_6] : memref<1x32x32xbf16, #tpu.memory_space<vmem>>, vector<1x32x32xbf16>
    %7 = vector.shape_cast %6 : vector<1x32x32xbf16> to vector<32x32xbf16>
    %cst = arith.constant dense<0.000000e+00> : vector<16x32xf32>
    %8 = tpu.matmul %5, %7, %cst {dimension_numbers = #tpu.dot_dimension_numbers<[1], [0], [0], [1], [0, 0, 1, 1], [], []>} : vector<16x32xbf16>, vector<32x32xbf16>, vector<16x32xf32> -> vector<16x32xf32>
    %9 = arith.addf %3, %8 : vector<16x32xf32>
    %c0_7 = arith.constant 0 : index
    %c0_8 = arith.constant 0 : index
    %10 = vector.load %arg8[%c0_7, %c0_8] : memref<16x32xf32, #tpu.memory_space<vmem>>, vector<16x32xf32>
    tpu.vector_store %arg8[%c0_7, %c0_8], %9 {strides = array<i32>} : memref<16x32xf32, #tpu.memory_space<vmem>>, vector<16x32xf32>,
    %c0_i32_9 = arith.constant 0 : i32
    %11 = arith.cmpi eq, %arg3, %c0_i32_9 : i32
    %12 = arith.extui %11 : i1 to i32
    %c0_i32_10 = arith.constant 0 : i32
    %13 = arith.cmpi ne, %12, %c0_i32_10 : i32
    scf.if %13 {
      %c0_11 = arith.constant 0 : index
      %c0_12 = arith.constant 0 : index
      %14 = vector.load %arg8[%c0_11, %c0_12] : memref<16x32xf32, #tpu.memory_space<vmem>>, vector<16x32xf32>
      %c0_13 = arith.constant 0 : index
      %c0_14 = arith.constant 0 : index
      %c0_15 = arith.constant 0 : index
      %15 = vector.load %arg6[%c0_13, %c0_14, %c0_15] : memref<1x1x32xf32, #tpu.memory_space<vmem>>, vector<1x1x32xf32>
      %16 = vector.shape_cast %15 : vector<1x1x32xf32> to vector<1x32xf32>
      %17 = vector.broadcast %16 : vector<1x32xf32> to vector<16x32xf32>
      %18 = arith.addf %14, %17 : vector<16x32xf32>
      %19 = arith.truncf %18 : vector<16x32xf32> to vector<16x32xbf16>
      %c0_16 = arith.constant 0 : index
      %c0_17 = arith.constant 0 : index
      %c0_18 = arith.constant 0 : index
      %20 = vector.load %arg7[%c0_16, %c0_17, %c0_18] : memref<1x16x32xbf16, #tpu.memory_space<vmem>>, vector<1x16x32xbf16>
      %21 = vector.shape_cast %20 : vector<1x16x32xbf16> to vector<16x32xbf16>
      %22 = vector.shape_cast %19 : vector<16x32xbf16> to vector<1x16x32xbf16>
      tpu.vector_store %arg7[%c0_16, %c0_17, %c0_18], %22 {strides = array<i32>} : memref<1x16x32xbf16, #tpu.memory_space<vmem>>, vector<1x16x32xbf16>,
    } else {
    }
    return
  }
  func.func @transform_0(%arg0: i32, %arg1: i32, %arg2: i32, %arg3: i32) -> (i32, i32) {
    %c0_i32 = arith.constant 0 : i32
    return %arg0, %arg3 : i32, i32
  }
  func.func @transform_1(%arg0: i32, %arg1: i32, %arg2: i32, %arg3: i32) -> (i32, i32, i32) {
    %c0_i32 = arith.constant 0 : i32
    return %arg1, %arg3, %arg2 : i32, i32, i32
  }
  func.func @transform_2(%arg0: i32, %arg1: i32, %arg2: i32, %arg3: i32) -> (i32, i32, i32) {
    %c0_i32 = arith.constant 0 : i32
    %c0_i32_0 = arith.constant 0 : i32
    return %arg1, %c0_i32, %arg2 : i32, i32, i32
  }
  func.func @transform_3(%arg0: i32, %arg1: i32, %arg2: i32, %arg3: i32) -> (i32, i32, i32) {
    %c0_i32 = arith.constant 0 : i32
    return %arg1, %arg0, %arg2 : i32, i32, i32
  }
}

</mosaic_0001>

<bundles_post_ra>
// kernel: tpu_custom_call.1
= control target key start
LH: loop header
LB: loop body
LE: loop exit
PB: predicated region body
PF: predicated region fallthrough
CT: control target
= control target key end

     0   :  { %8 = vsyncpa [#allocation4], 0  ;;  %s1005_s0 = inlined_call_operand.hbm [shape: f32[16,32], index: 0, kind: input, shape index: {}]   ;;  %s1006_s1 = inlined_call_operand.hbm [shape: bf16[3,32,32], index: 1, kind: input, shape index: {}]   ;;  %s1007_s2 = inlined_call_operand.vmem [shape: f32[3,1,32], index: 2, kind: input, shape index: {}]   ;;  %s1008_s3 = inlined_call_operand.hbm [shape: bf16[3,16,32], index: 3, kind: output, shape index: {}]  }
   0x1   :  { %9 = vsyncpa [#allocation7], 0 }
   0x2   :  { %11 = vsyncpa [#allocation7 + $0x1], 0 }
   0x3   :  { %12 = vsyncpa [#allocation5], 0 }
   0x4   :  { %14 = vsyncpa [#allocation5 + $0x1], 0  ;;  %s815_s12 = smov 0   ;;  %s817_s13 = smov 0  }
   0x5   :  { %s819_s14 = smov 0   ;;  %s821_s15 = smov 0  }
   0x6   :  { %s823_s16 = smov 0   ;;  %s825_s17 = smov 0  }
   0x7 LB: > { %s523_s18 = sadd.s32 4294967295, %s782_s17   ;;  %s524_s19 = sadd.s32 4294967294, %s782_s17   ;;  %s782_s17 = sphi %s825_s17, %s20_s17   ;;  %s778_s16 = sphi %s823_s16, %s1025_s16   ;;  %s774_s15 = sphi %s821_s15, %s1024_s15   ;;  %s770_s14 = sphi %s819_s14, %s1023_s14   ;;  %s766_s13 = sphi %s817_s13, %s1022_s13   ;;  %s762_s12 = sphi %s815_s12, %s1021_s12  }
   0x8   : > { %p98_p0 = scmp.ne.s32.totalorder %s766_s13, %s762_s12  ;;  %p849_p1 = scmp.eq.s32.totalorder %s523_s18, 0 }
   0x9   : > { %p853_p2 = scmp.eq.s32.totalorder %s523_s18, 2  ;;  %p160_p3 = scmp.eq.s32.totalorder %s524_s19, 2 }
   0xa   : > { %p859_p4 = por %p849_p1, %p98_p0  ;;  %p525_p5 = scmp.ge.s32.totalorder %s782_s17, 1 }
   0xb   : > { %p864_p6 = por %p160_p3, %p98_p0  ;;  %p167_p7 = scmp.lt.s32.totalorder %s782_s17, 4 }
   0xc   : > { %s784_s25 = smov [#allocation3]   ;;  %s42_s28 = sadd.s32 1, %s778_s16 }
   0xd   : > { %s1013_s23 = scalar_select %p864_p6, 1, 0 }
   0xe   : > { %p869_p8 = pnand %p525_p5, %p167_p7  ;;  %s183_s26 = sshll.u32 %s784_s25, 4  ;;  %s184_s26 = int_to_ptr.vmem [resolvable:$true] %s183_s26 }
   0xf   : > { %s655_s29 = scalar_lea.vmem %s184_s26, 256  ;;  %p663_p3 = scmp.lt.s32.totalorder %s184_s26, %s184_s26 }
  0x10   : > { %p569_p9 = pneg %p869_p8  ;;  %p656_p12 = scmp.ne.s32.totalorder %s184_s26, %s655_s29 }
  0x11   : > { %p664_p5 = scmp.lt.s32.totalorder %s655_s29, %s655_s29 }
  0x12   : > { %p877_p10 = pnand %p569_p9, %p849_p1 }
  0x13   : > { %p665_p7 = por %p664_p5, %p663_p3 }
  0x14   : > { %p646_p11 = pneg %p877_p10 }
  0x16   : > { %p658_p13 = pnand %p656_p12, %p646_p11 }
  0x18   : > { %p659_p0 = pneg %p658_p13 }
  0x1a   : > { %p666_p6 = pnand %p665_p7, %p659_p0 }
  0x1c   : > { %669 = shalt.err (!%p666_p6)
}
  0x1d   : > { %s785_s30 = smov 128   ;;  %s786_s4 = smov 8  }
  0x1e   : > { %572 = dma.hbm_to_vmem [thread:$0]  (!%p877_p10), %s1005_s0, 256, %s184_s26, [#allocation4], %s785_s30, %s785_s30, %s786_s4  }
  0x1f   : > { %p44_p9 = scmp.ge.s32.totalorder %s42_s28, 3  ;;  %s85_s7 = sadd.s32 1, %s770_s14 }
  0x20   : > { %p92_p6 = scmp.ne.s32.totalorder %s770_s14, %s766_s13  ;;  %p93_p11 = scmp.eq.s32.totalorder %s782_s17, 0 }
  0x21   : > { %s1027_s28 = smov (%p44_p9, %s42_s28), 0  ;;  %p582_p0 = scmp.lt.s32.totalorder %s782_s17, 3 }
  0x22   : > { %p895_p12 = por %p93_p11, %p92_p6  ;;  %p901_p13 = por %p853_p2, %p92_p6 }
  0x23   : > { %s78_s10 = ssub.s32 %s778_s16, %s1027_s28  ;;  %s197_s11 = sand.u32 1, %s770_s14  }
  0x24   : > { %s1017_s9 = scalar_select %p901_p13, 1, 0 }
  0x25   : > { %p83_p10 = scmp.eq.s32.totalorder %s78_s10, 0  ;;  %s528_s18 = sshll.u32 %s197_s11, 4 }
  0x26   : > { %s546_s25 = sshll.u32 %s778_s16, 8  ;;  %s201_s30 = scalar_lea.vmem [#allocation6], %s528_s18 }
  0x27   : > { %s910_s19 = scalar_select %p83_p10, %s770_s14, %s85_s7  }
  0x28   : > { %s210_s29 = scalar_lea.hbm %s1006_s1, %s546_s25  ;;  %s211_s4 = sshll.u32 %s201_s30, 4  ;;  %s212_s4 = int_to_ptr.vmem [resolvable:$true] %s211_s4 }
  0x29   : > { %p918_p2 = pnand %p582_p0, %p895_p12  ;;  %s198_s5 = scalar_lea.sflag [#allocation7], %s197_s11 }
  0x2a   : > { %s683_s6 = scalar_lea.vmem %s212_s4, 256  ;;  %s787_s7 = smov [#allocation6]  }
  0x2b   : > { %p672_p3 = pneg %p918_p2  ;;  %p684_p5 = scmp.ne.s32.totalorder %s212_s4, %s683_s6 }
  0x2c   : > { %s688_s10 = sshll.u32 %s787_s7, 4  ;;  %s689_s10 = int_to_ptr.vmem [resolvable:$false] %s688_s10 }
  0x2d   : > { %p686_p7 = pnand %p684_p5, %p672_p3  ;;  %s690_s25 = scalar_lea.vmem %s689_s10, 512 }
  0x2e   : > { %p691_p6 = scmp.lt.s32.totalorder %s212_s4, %s689_s10  ;;  %p692_p11 = scmp.lt.s32.totalorder %s690_s25, %s683_s6 }
  0x2f   : > { %p687_p9 = pneg %p686_p7 }
  0x30   : > { %p693_p10 = por %p692_p11, %p691_p6 }
  0x32   : > { %p694_p13 = pnand %p693_p10, %p687_p9 }
  0x34   : > { %697 = shalt.err (!%p694_p13)
}
  0x35   : > { %s788_s8 = smov 64   ;;  %s789_s18 = smov 4  }
  0x36   : > { %576 = dma.hbm_to_vmem [thread:$0]  (!%p918_p2), %s210_s29, 256, %s212_s4, %s198_s5, %s788_s8, %s788_s8, %s789_s18  }
  0x37   : > { %232 = sbr.rel (%p869_p8) target bundleno = 299 (0x12b), region = 32 }
  0x3c   : > { %749 = dma.done.wait (%p849_p1), [#allocation4], 256  }
  0x3d   : > { %751 = vsyncadd (%p849_p1), [#allocation4], 4294967040  ;;  %s933_s11 = sand.u32 1, %s766_s13  }
  0x3e   : > { %s533_s26 = sshll.u32 %s933_s11, 4  ;;  %s239_s27 = scalar_lea.sflag [#allocation7], %s933_s11 }
  0x3f   : > { %s242_s30 = scalar_lea.vmem [#allocation6], %s533_s26 }
  0x40   : > { %753 = dma.done.wait (%p859_p4), %s239_s27, 256  }
  0x41   : > { %755 = vsyncadd (%p859_p4), %s239_s27, 4294967040  ;;  %vm285_vm0 = vcmask 261120   ;;  %v790_v0 = vmov 0.0   ;;  %vm791_vm1 = vmmov 0   ;;  %v642_v1 = vld [vmem:[%s242_s30 + $0x8] sm:$0xff]   ;;  %v643_v2 = vld [vmem:[%s242_s30] sm:$0xff]  }
  0x42   : > { %553 = vmatprep.subr.bf16.mxu0 %v790_v0  ;;  %557 = vmatprep.mubr.msk.bf16.mxu0 %vm791_vm1, %v790_v0  ;;  %286 = vst.msk [vmem:[#allocation2] sm:$0xff] %vm285_vm0, %v790_v0  ;;  %287 = vst.msk [vmem:[#allocation2 + $0x8] sm:$0xff] %vm285_vm0, %v790_v0  ;;  %v290_v3 = vld [vmem:[#allocation3] sm:$0xff]  ;;  %v291_v4 = vld [vmem:[#allocation3 + $0x8] sm:$0xff]  ;;  %p273_p1 = scmp.lt.s32.totalorder %s774_s15, 2  ;;  %s534_s4 = sshll.u32 %s933_s11, 3 }
  0x43   : > { %554 = vmatpush3.bf16.msra.mxu0 %v642_v1  ;;  %v292_v5 = vpack.c.bf16 %v291_v4, %v290_v3  ;;  %vm380_vm2 = vcmask 257024   ;;  %s549_s21 = sshll.u32 %s774_s15, 7  ;;  %s270_s5 = scalar_lea.vmem [#allocation8], %s534_s4 }
  0x44   : > { %555 = vmatprep.subr.bf16.mxu0 %v790_v0  ;;  %s274_s20 = scalar_select %p273_p1, %s774_s15, 2 }
  0x45   : > { %s400_s6 = sshll.u32 %s270_s5, 4  ;;  %s956_s25 = scalar_lea.hbm %s1008_s3, %s549_s21  ;;  %s958_s6 = int_to_ptr.vmem [resolvable:$true] %s400_s6 }
  0x46   : > { %s278_s29 = scalar_lea.vmem %s1007_s2, %s274_s20  ;;  %s384_s8 = scalar_lea.sflag [#allocation5], %s933_s11 }
  0x47   : > { %556 = vmatpush3.bf16.msra.mxu0 %v643_v2  ;;  %v538_v14 = vld [vmem:[%s278_s29] ss:$0 sm:$0xff]  ;;  %s698_s18 = scalar_lea.vmem %s958_s6, 128  ;;  %p1019_p8 = scmp.ne.s32.totalorder %s1017_s9, 0 }
  0x48   : > { %p699_p4 = scmp.ne.s32.totalorder %s958_s6, %s698_s18  ;;  %s792_s15 = smov [#allocation8]  }
  0x49   : > { %v288_v6 = vld [vmem:[#allocation2] sm:$0xff]  ;;  %v289_v10 = vld [vmem:[#allocation2 + $0x8] sm:$0xff]  ;;  %s702_s26 = sshll.u32 %s792_s15, 4  ;;  %s703_s26 = int_to_ptr.vmem [resolvable:$false] %s702_s26 }
  0x4a   : > { %558 = vmatmul.mubr.msk.bf16.vlgmr.msra.gmra.mxu0 %vm285_vm0, %v292_v5  ;;  %p700_p12 = pnand %p699_p4, %p1019_p8  ;;  %s704_s27 = scalar_lea.vmem %s703_s26, 256 }
  0x4b   : > { %p705_p0 = scmp.lt.s32.totalorder %s958_s6, %s703_s26  ;;  %p706_p2 = scmp.lt.s32.totalorder %s704_s27, %s698_s18 }
  0x4c   : > { %p701_p13 = pneg %p700_p12 }
  0x4d   : > { %p707_p3 = por %p706_p2, %p705_p0 }
  0x4f   : > { %p708_p5 = pnand %p707_p3, %p701_p13 }
 0x10a   : > { %v347_v7 = vpop.f32.mrf.mxu0 }
 0x10b   : > { %v354_v8 = vadd.f32 %v347_v7, %v288_v6 }
 0x10c   : > { %v559_v9 = vpop.f32.mrf.mxu0 }
 0x10d   : > { %356 = vst.msk [vmem:[#allocation2] sm:$0xff] %vm285_vm0, %v354_v8 }
 0x10e   : > { %v350_v11 = vpop.f32.mrf.mxu0 }
 0x10f   : > { %v355_v12 = vadd.f32 %v350_v11, %v289_v10 }
 0x110   : > { %v560_v13 = vpop.f32.mrf.mxu0 }
 0x111   : > { %357 = vst.msk [vmem:[#allocation2 + $0x8] sm:$0xff] %vm285_vm0, %v355_v12 }
 0x114   : > { %v361_v15 = vld [vmem:[#allocation2] sm:$0xff] }
 0x115   : > { %v370_v16 = vadd.f32 %v538_v14, %v361_v15 }
 0x117   : > { %v547_v17 = vpack.c.bf16 %v370_v16, %v370_v16 }
 0x118   : > { %v362_v18 = vld [vmem:[#allocation2 + $0x8] sm:$0xff] }
 0x119   : > { %v371_v19 = vadd.f32 %v538_v14, %v362_v18  ;;  %381 = vst.msk [vmem:[%s270_s5] sm:$0xf] %vm380_vm2, %v547_v17 }
 0x11b   : > { %v548_v20 = vpack.c.bf16 %v371_v19, %v371_v19 }
 0x11d   : > { %382 = vst.msk [vmem:[%s270_s5 + $0x4] sm:$0xf] %vm380_vm2, %v548_v20 }
 0x11e   : > { %711 = shalt.err (!%p708_p5)
}
 0x11f   : > { %s712_s30 = scalar_lea.hbm %s956_s25, 128  ;;  %s716_s24 = scalar_lea.hbm %s1008_s3, 384 }
 0x120   : > { %p713_p7 = scmp.ne.s32.totalorder %s956_s25, %s712_s30  ;;  %p717_p11 = scmp.lt.s32.totalorder %s956_s25, %s1008_s3 }
 0x121   : > { %p718_p10 = scmp.lt.s32.totalorder %s716_s24, %s712_s30 }
 0x122   : > { %p714_p9 = pnand %p713_p7, %p1019_p8 }
 0x123   : > { %p719_p1 = por %p718_p10, %p717_p11 }
 0x124   : > { %p715_p6 = pneg %p714_p9 }
 0x126   : > { %p720_p4 = pnand %p719_p1, %p715_p6 }
 0x128   : > { %723 = shalt.err (!%p720_p4)
}
 0x129   : > { %s793_s21 = smov 64   ;;  %s794_s5 = smov 4  }
 0x12a   : > { %567 = dma.vmem_to_hbm [thread:$0]  (%p1019_p8), %s958_s6, 128, %s956_s25, %s384_s8, %s793_s21, %s793_s21, %s794_s5  }
 0x12b PF: > { %p584_p12 = scmp.ge.s32.totalorder %s782_s17, 2  ;;  %s415_s7 = sand.u32 1, %s762_s12  }
 0x12c   : > { %p1020_p13 = scmp.ne.s32.totalorder %s1013_s23, 0  ;;  %s416_s10 = scalar_lea.sflag [#allocation5], %s415_s7 }
 0x12e   : > { %p578_p0 = pnand %p584_p12, %p1020_p13 }
 0x130   : > { %p579_p2 = pneg %p578_p0 }
 0x132   : > { %757 = dma.done.wait (%p579_p2), %s416_s10, 128  }
 0x133   : > { %759 = vsyncadd (%p579_p2), %s416_s10, 4294967168  ;;  %s20_s17 = sadd.s32 1, %s782_s17   ;;  %s1021_s12 = smov %s766_s13 }
 0x134   : > { %p17_p3 = scmp.ge.s32.totalorder %s20_s17, 5   ;;  %s1022_s13 = smov %s770_s14 }
 0x135   : > { %s1023_s14 = smov %s910_s19  ;;  %s1024_s15 = smov %s778_s16 }
 0x136   : > { %s1025_s16 = smov %s1027_s28  ;;  %19 = sbr.rel (!%p17_p3) target bundleno = 7 (0x7), region = 94 }
 0x13b   :  { %421 = vsyncpa [#allocation4], 1 }
 0x13c   :  { %423 = vsyncpa [#allocation4 + $0x1], 1 }
 0x13d   :  { %424 = vsyncpa [#allocation7], 1 }
 0x13e   :  { %426 = vsyncpa [#allocation7 + $0x1], 1 }
 0x13f   :  { %427 = vsyncpa [#allocation5], 1 }
 0x140   :  { %429 = vsyncpa [#allocation5 + $0x1], 1 }

</bundles_post_ra>
